<compile_context>
chip_gen: v5e
topology: v5e:2x2
jax: 0.10.0
libtpu: 0.0.40
codegen_flags: <defaults>
</compile_context>

<pallas_src>
import functools
from typing import NamedTuple

import jax
import jax.numpy as jnp
from jax.experimental import pallas as pl
from jax.experimental.pallas import tpu as pltpu


def _round_up(v: int, m: int) -> int:
    return (v + m - 1) // m * m


class RBFParams(NamedTuple):
    ct_scaled: jax.Array      # (D, Cp)  = centers.T / sigma^2, zero-padded columns
    csq_scaled: jax.Array     # (1, Cp)  = -||c||^2 / (2*sigma^2), zero-padded
    num_centers: int          # original C (for slicing the output)
    block_c: int              # lane tile of the padded centers axis
    neg_inv_two_sigma_sq: float


def rbf_prepare_params(centers, sigma, *, block_c=None) -> RBFParams:
    """One-time parameter prep (call once per (centers, sigma), cache the result)."""
    C, D = centers.shape
    c = centers if centers.dtype == jnp.float32 else centers.astype(jnp.float32)
    inv_sigma_sq = 1.0 / (sigma * sigma)

    # Centers-axis tile: multiple of 128 lanes; second grid axis for large C.
    if block_c is None:
        block_c = _round_up(C, 128) if C <= 2048 else 2048
    block_c = _round_up(block_c, 128)
    Cp = _round_up(C, block_c)

    ct_scaled = jnp.zeros((D, Cp), jnp.float32).at[:, :C].set(c.T * inv_sigma_sq)
    csq_scaled = jnp.zeros((1, Cp), jnp.float32).at[:, :C].set(
        (-0.5 * inv_sigma_sq) * jnp.sum(c * c, axis=1)[None, :]
    )
    return RBFParams(ct_scaled, csq_scaled, C, block_c, -0.5 * inv_sigma_sq)


def rbf_kernel(x_ref, ct_ref, csq_ref, o_ref, *, neg_inv_two_sigma_sq):
    x = x_ref[...]                                                     # (TB, D)  f32
    # Cross term on the MXU; sigma^-2 and the -2 are already folded into ct/csq.
    cross = jnp.dot(x, ct_ref[...], preferred_element_type=jnp.float32)  # (TB, Cb)
    # Only a (TB, 1) column needs in-kernel scaling.
    x_sq = jnp.sum(x * x, axis=1, keepdims=True) * neg_inv_two_sigma_sq  # (TB, 1)
    # exp argument is <= 0 up to rounding; tiny positive residual is harmless.
    o_ref[...] = jnp.exp(cross + csq_ref[...] + x_sq).astype(o_ref.dtype)


def rbf_forward(x, params: RBFParams, *, block_b=None, out_dtype=jnp.float32):
    B, D = x.shape
    Dp, Cp = params.ct_scaled.shape
    assert D == Dp
    block_c = params.block_c
    C = params.num_centers

    # --- batch tiling ---------------------------------------------------------
    if block_b is None:
        if B >= 2048:
            block_b = 1024
        elif B >= 1024:
            block_b = 512
        elif B >= 16:
            # keep >= 2 grid steps so dual-TensorCore chips (v7x) can shard the axis
            block_b = _round_up((B + 1) // 2, 8)
        else:
            block_b = _round_up(max(B, 1), 8)
    Bp = _round_up(B, block_b)

    xp = x if x.dtype == jnp.float32 else x.astype(jnp.float32)
    if Bp != B:
        xp = jnp.pad(xp, ((0, Bp - B), (0, 0)))

    grid = (Bp // block_b, Cp // block_c)

    # --- explicit VMEM budget (double-buffered streamed tiles + resident params)
    out_itemsize = jnp.dtype(out_dtype).itemsize
    vmem_bytes = (
        2 * block_b * D * 4                       # x tile (double-buffered)
        + 2 * block_b * block_c * out_itemsize    # out tile (double-buffered)
        + 2 * block_b * block_c * 4               # f32 exp temporaries
        + 2 * (D * block_c + block_c) * 4         # ct + csq tiles
    )
    vmem_limit = min(int(vmem_bytes * 1.5) + (2 << 20), 64 << 20)

    kernel = functools.partial(
        rbf_kernel, neg_inv_two_sigma_sq=params.neg_inv_two_sigma_sq
    )

    out = pl.pallas_call(
        kernel,
        out_shape=jax.ShapeDtypeStruct((Bp, Cp), out_dtype),
        grid=grid,
        in_specs=[
            pl.BlockSpec((block_b, D), lambda i, j: (i, 0)),       # streamed x tile
            pl.BlockSpec((D, block_c), lambda i, j: (0, j)),       # centers^T (resident over i)
            pl.BlockSpec((1, block_c), lambda i, j: (0, j)),       # -||c||^2/(2s^2)
        ],
        out_specs=pl.BlockSpec((block_b, block_c), lambda i, j: (i, j)),
        compiler_params=pltpu.CompilerParams(
            dimension_semantics=("parallel", "parallel"),
            vmem_limit_bytes=vmem_limit,
        ),
    )(xp, params.ct_scaled, params.csq_scaled)

    # Slice away batch / center padding.
    return out[:B, :C]


if __name__ == "__main__":
    # Module hyper-parameters from the PyTorch script: sigma = 0.1, num_centers = 100.
    in_features = 32
    num_centers = 100
    sigma = 0.1
    batch = 8

    key = jax.random.PRNGKey(0)
    k_x, k_c = jax.random.split(key)

    # centers ~ uniform(-1, 1), matching reset_parameters().
    centers = jax.random.uniform(
        k_c, (num_centers, in_features), dtype=jnp.float32, minval=-1.0, maxval=1.0
    )
    x = jax.random.normal(k_x, (batch, in_features), dtype=jnp.float32)
    # Make a couple of rows land near/on centers so the test exercises
    # non-underflowed output values (most random pairs give exp(~-2000) == 0).
    x = x.at[0].set(centers[0] + 0.05)
    x = x.at[1].set(centers[1])

    params = rbf_prepare_params(centers, sigma)      # one-time prep, reused across calls
    out = rbf_forward(x, params)
    out = jax.block_until_ready(out)

    # Pure-JAX reference (mirrors the PyTorch broadcast/norm formulation).
    diff = x[:, None, :] - centers[None, :, :]
    ref = jnp.exp(-jnp.sum(diff * diff, axis=2) / (2.0 * sigma * sigma))

    assert out.shape == (batch, num_centers)
    assert jnp.allclose(out, ref, atol=1e-3, rtol=1e-3)

    print("KERNEL_OK")
</pallas_src>

<mosaic_0001>
module attributes {stable_mosaic.version = 11 : i64} {
  func.func @rbf_kernel(%arg0: i32, %arg1: i32, %arg2: memref<8x32xf32, #tpu.memory_space<vmem>>, %arg3: memref<32x128xf32, #tpu.memory_space<vmem>>, %arg4: memref<1x128xf32, #tpu.memory_space<vmem>>, %arg5: memref<8x128xf32, #tpu.memory_space<vmem>>) attributes {dimension_semantics = [#tpu.dimension_semantics<parallel>, #tpu.dimension_semantics<parallel>], iteration_bounds = array<i64: 1, 1>, scalar_prefetch = 0 : i64, scratch_operands = 0 : i64, tpu.core_type = #tpu.core_type<tc>, window_params = [{transform_indices = @transform_0, window_bounds = array<i64: 8, 32>}, {transform_indices = @transform_1, window_bounds = array<i64: 32, 128>}, {transform_indices = @transform_2, window_bounds = array<i64: 1, 128>}, {transform_indices = @transform_3, window_bounds = array<i64: 8, 128>}]} {
    %c0 = arith.constant 0 : index
    %c0_0 = arith.constant 0 : index
    %0 = vector.load %arg2[%c0, %c0_0] : memref<8x32xf32, #tpu.memory_space<vmem>>, vector<8x32xf32>
    %c0_1 = arith.constant 0 : index
    %c0_2 = arith.constant 0 : index
    %1 = vector.load %arg3[%c0_1, %c0_2] : memref<32x128xf32, #tpu.memory_space<vmem>>, vector<32x128xf32>
    %cst = arith.constant dense<0.000000e+00> : vector<8x128xf32>
    %2 = tpu.matmul %0, %1, %cst {dimension_numbers = #tpu.dot_dimension_numbers<[1], [0], [0], [1], [0, 0, 1, 1], [], []>} : vector<8x32xf32>, vector<32x128xf32>, vector<8x128xf32> -> vector<8x128xf32>
    %3 = arith.mulf %0, %0 : vector<8x32xf32>
    %cst_3 = arith.constant dense<0.000000e+00> : vector<8xf32>
    %4 = vector.multi_reduction <add>, %3, %cst_3 [1] : vector<8x32xf32> to vector<8xf32>
    %5 = vector.shape_cast %4 : vector<8xf32> to vector<8x1xf32>
    %cst_4 = arith.constant -5.000000e+01 : f32
    %6 = vector.broadcast %cst_4 : f32 to vector<8x1xf32>
    %7 = arith.mulf %5, %6 : vector<8x1xf32>
    %c0_5 = arith.constant 0 : index
    %c0_6 = arith.constant 0 : index
    %8 = vector.load %arg4[%c0_5, %c0_6] : memref<1x128xf32, #tpu.memory_space<vmem>>, vector<1x128xf32>
    %9 = vector.broadcast %8 : vector<1x128xf32> to vector<8x128xf32>
    %10 = arith.addf %2, %9 : vector<8x128xf32>
    %11 = vector.broadcast %7 : vector<8x1xf32> to vector<8x128xf32>
    %12 = arith.addf %10, %11 : vector<8x128xf32>
    %13 = math.exp %12 : vector<8x128xf32>
    %c0_7 = arith.constant 0 : index
    %c0_8 = arith.constant 0 : index
    %14 = vector.load %arg5[%c0_7, %c0_8] : memref<8x128xf32, #tpu.memory_space<vmem>>, vector<8x128xf32>
    tpu.vector_store %arg5[%c0_7, %c0_8], %13 {strides = array<i32>} : memref<8x128xf32, #tpu.memory_space<vmem>>, vector<8x128xf32>,
    return
  }
  func.func @transform_0(%arg0: i32, %arg1: i32) -> (i32, i32) {
    %c0_i32 = arith.constant 0 : i32
    %c0_i32_0 = arith.constant 0 : i32
    return %arg0, %c0_i32 : i32, i32
  }
  func.func @transform_1(%arg0: i32, %arg1: i32) -> (i32, i32) {
    %c0_i32 = arith.constant 0 : i32
    %c0_i32_0 = arith.constant 0 : i32
    return %c0_i32, %arg1 : i32, i32
  }
  func.func @transform_2(%arg0: i32, %arg1: i32) -> (i32, i32) {
    %c0_i32 = arith.constant 0 : i32
    %c0_i32_0 = arith.constant 0 : i32
    return %c0_i32, %arg1 : i32, i32
  }
  func.func @transform_3(%arg0: i32, %arg1: i32) -> (i32, i32) {
    %c0_i32 = arith.constant 0 : i32
    return %arg0, %arg1 : i32, i32
  }
}

</mosaic_0001>

<bundles_post_ra>
// kernel: tpu_custom_call.1
= control target key start
LH: loop header
LB: loop body
LE: loop exit
PB: predicated region body
PF: predicated region fallthrough
CT: control target
= control target key end

     0   :  { %8 = vsyncpa [#allocation3], 0  ;;  %s229_s0 = inlined_call_operand.hbm [shape: f32[8,32], index: 0, kind: input, shape index: {}]   ;;  %s230_s1 = inlined_call_operand.hbm [shape: f32[32,128], index: 1, kind: input, shape index: {}]   ;;  %s231_s2 = inlined_call_operand.vmem [shape: f32[1,128], index: 2, kind: input, shape index: {}]   ;;  %s232_s3 = inlined_call_operand.hbm [shape: f32[8,128], index: 3, kind: output, shape index: {}]  }
   0x1   :  { %9 = vsyncpa [#allocation6], 0 }
   0x2   :  { %10 = vsyncpa [#allocation4], 0  ;;  %s16_s14 = sshll.u32 %s229_s0, 4  ;;  %s192_s15 = smov [#allocation2]   ;;  %s17_s14 = int_to_ptr.hbm [resolvable:$true] %s16_s14 }
   0x3   :  { %s18_s16 = sshll.u32 %s192_s15, 4  ;;  %s26_s19 = sshll.u32 %s230_s1, 4  ;;  %s19_s16 = int_to_ptr.vmem [resolvable:$true] %s18_s16  ;;  %s27_s19 = int_to_ptr.hbm [resolvable:$true] %s26_s19 }
   0x4   :  { %21 = dma.hbm_to_vmem [thread:$0]  %s17_s14, 128, %s19_s16, [#allocation3]  }
   0x5   :  { %s193_s20 = smov [#allocation5]   ;;  %s194_s22 = smov 128  }
   0x6   :  { %s28_s21 = sshll.u32 %s193_s20, 4  ;;  %s195_s23 = smov 8   ;;  %s29_s21 = int_to_ptr.vmem [resolvable:$true] %s28_s21 }
   0x7   :  { %34 = dma.hbm_to_vmem [thread:$0]  %s27_s19, 512, %s29_s21, [#allocation6], %s194_s22, %s194_s22, %s195_s23  }
   0x8   :  { %186 = dma.done.wait [#allocation3], 128  }
   0x9   :  { %187 = vsyncadd [#allocation3], 4294967168 }
   0xa   :  { %188 = dma.done.wait [#allocation6], 512  }
   0xb   :  { %189 = vsyncadd [#allocation6], 4294966784  ;;  %v49_v0 = vld [vmem:[#allocation5 + $0x18] sm:$0xff]  ;;  %v48_v1 = vld [vmem:[#allocation5 + $0x10] sm:$0xff]  ;;  %vm51_vm0 = vcmask 261120   ;;  %s196_s24 = smov [#allocation7]  }
   0xc   :  { %75 = vmatpush.msra.mxu0 %v49_v0  ;;  %v45_v2 = vld [vmem:[#allocation2] sm:$0xff]  ;;  %v47_v3 = vld [vmem:[#allocation5 + $0x8] sm:$0xff]  ;;  %v46_v5 = vld [vmem:[#allocation5] sm:$0xff]  ;;  %s92_s25 = sshll.u32 %s196_s24, 4  ;;  %s94_s28 = sshll.u32 %s232_s3, 4  ;;  %s93_s25 = int_to_ptr.vmem [resolvable:$true] %s92_s25  ;;  %s95_s28 = int_to_ptr.hbm [resolvable:$true] %s94_s28 }
   0xd   :  { %v50_v4 = vmul.f32 %v45_v2, %v45_v2  ;;  %v111_v8 = vld [vmem:[%s231_s2] ss:$0 sm:$0xff] }
   0xe   :  { %76 = vmatpush.msra.mxu0 %v48_v1 }
   0xf   :  { %v52_v6 = vsel %vm51_vm0, %v50_v4, 0.0 }
  0x10   :  { %77 = vmatpush.msra.mxu0 %v47_v3  ;;  %53 = vadd.xlane.f32.xlu0 %v52_v6 }
  0x12   :  { %78 = vmatpush.msra.mxu0 %v46_v5 }
  0x13   :  { %105 = vmatmul.msk.f32.vlgmr.msra.gmra.mxu0 %vm51_vm0, %v45_v2 }
  0x83   :  { %v54_v7 = vpop.xlane.xlu0 %53 }
  0x84   :  { %v55_v9 = vmul.f32 -50.0, %v54_v7 }
  0x90   :  { %v80_v10 = vpop.f32.mrf.mxu0 }
  0x91   :  { %v81_v11 = vadd.f32 %v111_v8, %v80_v10 }
  0x93   :  { %v83_v12 = vadd.f32 %v81_v11, %v55_v9 }
  0x95   :  { %v84_v13 = vmul.f32 1.442695, %v83_v12 }
  0x97   :  { %112 = vpow2.f32 %v84_v13 }
  0x9d   :  { %v113_v14 = vpop.eup %112 }
  0x9e   :  { %86 = vst [vmem:[#allocation7] sm:$0xff] %v113_v14 }
  0x9f   :  { %97 = dma.vmem_to_hbm [thread:$0]  %s93_s25, 128, %s95_s28, [#allocation4]  }
  0xa0   :  { %190 = dma.done.wait [#allocation4], 128  }
  0xa1   :  { %191 = vsyncadd [#allocation4], 4294967168 }
  0xa2   :  { %102 = vsyncpa [#allocation3], 1 }
  0xa3   :  { %103 = vsyncpa [#allocation6], 1 }
  0xa4   :  { %104 = vsyncpa [#allocation4], 1 }

</bundles_post_ra>
